<compile_context>
chip_gen: v7x
topology: tpu7x:2x2x1
jax: 0.10.0
libtpu: 0.0.40
codegen_flags: <defaults>
</compile_context>

<pallas_src>
import functools

import jax
import jax.numpy as jnp
from jax.experimental import pallas as pl
from jax.experimental.pallas import tpu as pltpu


def _round_up(x, m):
    return ((x + m - 1) // m) * m


def _pick_row_tile(n_i, n_c, itemsize):
    """Biggest row tile whose double-buffered logits block stays well under scoped VMEM."""
    budget_bytes = 8 * 1024 * 1024                       # conservative across v5e/v6e/v7x
    tm = budget_bytes // max(1, 2 * n_c * itemsize)      # 2x for double buffering
    tm = min(tm, 1024, _round_up(n_i, 8))
    tm = max(8, (tm // 8) * 8)                           # multiple of 8 sublanes
    return tm


def _equal_loss_kernel(logits_ref, labels_ref, beta_ref, cw_ref, loss_ref):
    # Load in native dtype, cast to f32 in-register (keeps HBM traffic at native width).
    logits = logits_ref[...].astype(jnp.float32)          # (TM, n_c)
    labels = labels_ref[...]                               # (TM, 1)  i32
    beta = beta_ref[...]                                   # (TM, 1)  f32
    cw = cw_ref[...]                                        # (1, n_c) f32

    tm, n_c = logits.shape

    # One-hot membership built in-kernel via iota compare (no gather needed).
    class_ids = jax.lax.broadcasted_iota(jnp.int32, (tm, n_c), 1)
    is_label = class_ids == labels                          # (TM, n_c) bool

    # eql_w = 1 - beta * cw * (1 - target)  ==  where(is_label, 1, 1 - beta*cw)
    bc = beta * cw                                          # single broadcasted mul (TM, n_c)
    eql_w = jnp.where(is_label, 1.0, 1.0 - bc)

    # Stabilized single log-sum-exp:
    #   loss = -log(exp(l[label]) / sum(eql_w * exp(l)))
    #        = log(sum(eql_w * exp(l - m))) + m - l[label]
    m = jnp.max(logits, axis=1, keepdims=True)              # (TM, 1)
    z = jnp.exp(logits - m)                                  # (TM, n_c)
    denom = jnp.sum(eql_w * z, axis=1, keepdims=True)        # (TM, 1)
    logit_at_label = jnp.sum(jnp.where(is_label, logits, 0.0),
                             axis=1, keepdims=True)          # (TM, 1)

    loss_ref[...] = jnp.log(denom) + m - logit_at_label      # (TM, 1) per-row loss


def equal_loss(logits, labels, freq_info, *, gamma=0.9, lambda_=0.00177,
               size_average=True, beta_key=None):
    """JAX/Pallas implementation of Equal_Loss.forward."""
    n_i, n_c = logits.shape
    itemsize = jnp.dtype(logits.dtype).itemsize

    # threshold_func: per-class weight, 1 where freq_info < lambda_
    class_w = (freq_info < lambda_).astype(jnp.float32).reshape(1, n_c)

    # beta = (rand(n_i) < gamma).float()  -- stochastic mask, deterministic given key.
    # (torch.rand re-samples each forward; here the caller controls the key.)
    if beta_key is None:
        beta_key = jax.random.PRNGKey(0)
    u = jax.random.uniform(beta_key, (n_i,), dtype=jnp.float32)
    beta = (u < gamma).astype(jnp.float32).reshape(n_i, 1)

    labels2d = labels.astype(jnp.int32).reshape(n_i, 1)

    # Row tiling (padded rows are computed but sliced off before the reduction).
    tm = _pick_row_tile(n_i, n_c, itemsize)
    n_i_pad = _round_up(n_i, tm)
    num_tiles = n_i_pad // tm
    if n_i_pad != n_i:
        pad = n_i_pad - n_i
        logits = jnp.pad(logits, ((0, pad), (0, 0)))
        labels2d = jnp.pad(labels2d, ((0, pad), (0, 0)))
        beta = jnp.pad(beta, ((0, pad), (0, 0)))

    cost = pl.CostEstimate(
        flops=int(6 * n_i_pad * n_c),
        transcendentals=int(n_i_pad * n_c + n_i_pad),
        bytes_accessed=int(n_i_pad * n_c * itemsize + n_i_pad * 12 + n_c * 4),
    )

    per_row = pl.pallas_call(
        _equal_loss_kernel,
        out_shape=jax.ShapeDtypeStruct((n_i_pad, 1), jnp.float32),
        grid=(num_tiles,),
        in_specs=[
            pl.BlockSpec((tm, n_c), lambda i: (i, 0)),    # logits (native dtype)
            pl.BlockSpec((tm, 1), lambda i: (i, 0)),      # labels
            pl.BlockSpec((tm, 1), lambda i: (i, 0)),      # beta
            pl.BlockSpec((1, n_c), lambda i: (0, 0)),     # class threshold weights
        ],
        out_specs=pl.BlockSpec((tm, 1), lambda i: (i, 0)),
        compiler_params=pltpu.CompilerParams(
            dimension_semantics=("parallel",),            # independent tiles -> 2 TCs on v7x
            vmem_limit_bytes=32 * 1024 * 1024,
        ),
        cost_estimate=cost,
    )(logits, labels2d, beta, class_w)

    valid = per_row[:n_i, 0]
    return jnp.mean(valid) if size_average else jnp.sum(valid)


def _reference_equal_loss(logits, labels, freq_info, beta, *,
                          lambda_=0.00177, size_average=True):
    """Pure-JAX reference mirroring the PyTorch forward (same beta realization)."""
    n_i, n_c = logits.shape
    logits = logits.astype(jnp.float32)
    target = jax.nn.one_hot(labels, n_c, dtype=jnp.float32)
    cw = (freq_info < lambda_).astype(jnp.float32).reshape(1, n_c)
    eql_w = 1.0 - beta * cw * (1.0 - target)
    e = jnp.exp(logits)
    denom = jnp.sum(eql_w * e, axis=1)
    numer = jnp.take_along_axis(e, labels.reshape(-1, 1), axis=1)[:, 0]
    loss = -jnp.log(numer / denom)
    return jnp.mean(loss) if size_average else jnp.sum(loss)


if __name__ == "__main__":
    gamma = 0.9
    lambda_ = 0.00177

    n_i, n_c = 8, 32

    # Deterministic synthetic "image count frequency": some classes below lambda_.
    freq_info = jnp.linspace(1e-4, 1e-2, n_c).astype(jnp.float32)
    num_included = int(jnp.sum(freq_info < lambda_))
    print("set up Equal_Loss:")
    print("    gamma = {}".format(gamma))
    print("    lambda_ = {}".format(lambda_))
    print("    {} classes included.".format(num_included))

    key = jax.random.PRNGKey(0)
    k_logits, k_labels, k_beta, k2_logits, k2_labels, k2_beta = jax.random.split(key, 6)

    # Case 1: mean reduction, tile-aligned batch.
    logits = jax.random.normal(k_logits, (n_i, n_c), dtype=jnp.float32)
    labels = jax.random.randint(k_labels, (n_i,), 0, n_c, dtype=jnp.int32)
    loss = equal_loss(logits, labels, freq_info, gamma=gamma, lambda_=lambda_,
                      size_average=True, beta_key=k_beta)
    loss = jax.block_until_ready(loss)

    u = jax.random.uniform(k_beta, (n_i,), dtype=jnp.float32)
    beta = (u < gamma).astype(jnp.float32).reshape(n_i, 1)
    ref = _reference_equal_loss(logits, labels, freq_info, beta,
                                lambda_=lambda_, size_average=True)
    assert jnp.allclose(loss, ref, rtol=1e-5, atol=1e-5), (loss, ref)

    # Case 2: sum reduction, batch not a multiple of 8 (exercises row padding).
    n_i2 = 10
    logits2 = jax.random.normal(k2_logits, (n_i2, n_c), dtype=jnp.float32)
    labels2 = jax.random.randint(k2_labels, (n_i2,), 0, n_c, dtype=jnp.int32)
    loss2 = equal_loss(logits2, labels2, freq_info, gamma=gamma, lambda_=lambda_,
                       size_average=False, beta_key=k2_beta)
    loss2 = jax.block_until_ready(loss2)

    u2 = jax.random.uniform(k2_beta, (n_i2,), dtype=jnp.float32)
    beta2 = (u2 < gamma).astype(jnp.float32).reshape(n_i2, 1)
    ref2 = _reference_equal_loss(logits2, labels2, freq_info, beta2,
                                 lambda_=lambda_, size_average=False)
    assert jnp.allclose(loss2, ref2, rtol=1e-5, atol=1e-5), (loss2, ref2)

    print("KERNEL_OK")
</pallas_src>

<mosaic_0001>
module attributes {stable_mosaic.version = 11 : i64} {
  func.func @_equal_loss_kernel(%arg0: i32, %arg1: memref<8x32xf32, #tpu.memory_space<vmem>>, %arg2: memref<8x1xi32, #tpu.memory_space<vmem>>, %arg3: memref<8x1xf32, #tpu.memory_space<vmem>>, %arg4: memref<1x32xf32, #tpu.memory_space<vmem>>, %arg5: memref<8x1xf32, #tpu.memory_space<vmem>>) attributes {dimension_semantics = [#tpu.dimension_semantics<parallel>], iteration_bounds = array<i64: 1>, scalar_prefetch = 0 : i64, scratch_operands = 0 : i64, tpu.core_type = #tpu.core_type<tc>, window_params = [{transform_indices = @transform_0, window_bounds = array<i64: 8, 32>}, {transform_indices = @transform_1, window_bounds = array<i64: 8, 1>}, {transform_indices = @transform_2, window_bounds = array<i64: 8, 1>}, {pipeline_mode = #tpu.pipeline_mode<synchronous>, transform_indices = @transform_3, window_bounds = array<i64: 1, 32>}, {transform_indices = @transform_4, window_bounds = array<i64: 8, 1>}]} {
    %c0 = arith.constant 0 : index
    %c0_0 = arith.constant 0 : index
    %0 = vector.load %arg1[%c0, %c0_0] : memref<8x32xf32, #tpu.memory_space<vmem>>, vector<8x32xf32>
    %c0_1 = arith.constant 0 : index
    %c0_2 = arith.constant 0 : index
    %1 = vector.load %arg2[%c0_1, %c0_2] : memref<8x1xi32, #tpu.memory_space<vmem>>, vector<8x1xi32>
    %c0_3 = arith.constant 0 : index
    %c0_4 = arith.constant 0 : index
    %2 = vector.load %arg3[%c0_3, %c0_4] : memref<8x1xf32, #tpu.memory_space<vmem>>, vector<8x1xf32>
    %c0_5 = arith.constant 0 : index
    %c0_6 = arith.constant 0 : index
    %3 = vector.load %arg4[%c0_5, %c0_6] : memref<1x32xf32, #tpu.memory_space<vmem>>, vector<1x32xf32>
    %4 = tpu.iota {dimensions = array<i32: 1>} : vector<8x32xi32>
    %5 = vector.broadcast %1 : vector<8x1xi32> to vector<8x32xi32>
    %6 = arith.cmpi eq, %4, %5 : vector<8x32xi32>
    %7 = vector.broadcast %2 : vector<8x1xf32> to vector<8x32xf32>
    %8 = vector.broadcast %3 : vector<1x32xf32> to vector<8x32xf32>
    %9 = arith.mulf %7, %8 : vector<8x32xf32>
    %cst = arith.constant 1.000000e+00 : f32
    %10 = vector.broadcast %cst : f32 to vector<8x32xf32>
    %11 = arith.subf %10, %9 : vector<8x32xf32>
    %cst_7 = arith.constant 1.000000e+00 : f32
    %12 = vector.broadcast %cst_7 : f32 to vector<8x32xf32>
    %13 = arith.select %6, %12, %11 : vector<8x32xi1>, vector<8x32xf32>
    %cst_8 = arith.constant dense<0xFF800000> : vector<8xf32>
    %14 = vector.multi_reduction <maximumf>, %0, %cst_8 [1] : vector<8x32xf32> to vector<8xf32>
    %15 = vector.shape_cast %14 : vector<8xf32> to vector<8x1xf32>
    %16 = vector.broadcast %15 : vector<8x1xf32> to vector<8x32xf32>
    %17 = arith.subf %0, %16 : vector<8x32xf32>
    %18 = math.exp %17 : vector<8x32xf32>
    %19 = arith.mulf %13, %18 : vector<8x32xf32>
    %cst_9 = arith.constant dense<0.000000e+00> : vector<8xf32>
    %20 = vector.multi_reduction <add>, %19, %cst_9 [1] : vector<8x32xf32> to vector<8xf32>
    %21 = vector.shape_cast %20 : vector<8xf32> to vector<8x1xf32>
    %cst_10 = arith.constant 0.000000e+00 : f32
    %22 = vector.broadcast %cst_10 : f32 to vector<8x32xf32>
    %23 = arith.select %6, %0, %22 : vector<8x32xi1>, vector<8x32xf32>
    %cst_11 = arith.constant dense<0.000000e+00> : vector<8xf32>
    %24 = vector.multi_reduction <add>, %23, %cst_11 [1] : vector<8x32xf32> to vector<8xf32>
    %25 = vector.shape_cast %24 : vector<8xf32> to vector<8x1xf32>
    %26 = math.log %21 : vector<8x1xf32>
    %27 = arith.addf %26, %15 : vector<8x1xf32>
    %28 = arith.subf %27, %25 : vector<8x1xf32>
    %c0_12 = arith.constant 0 : index
    %c0_13 = arith.constant 0 : index
    %29 = vector.load %arg5[%c0_12, %c0_13] : memref<8x1xf32, #tpu.memory_space<vmem>>, vector<8x1xf32>
    tpu.vector_store %arg5[%c0_12, %c0_13], %28 {strides = array<i32>} : memref<8x1xf32, #tpu.memory_space<vmem>>, vector<8x1xf32>,
    return
  }
  func.func @transform_0(%arg0: i32) -> (i32, i32) {
    %c0_i32 = arith.constant 0 : i32
    %c0_i32_0 = arith.constant 0 : i32
    return %arg0, %c0_i32 : i32, i32
  }
  func.func @transform_1(%arg0: i32) -> (i32, i32) {
    %c0_i32 = arith.constant 0 : i32
    %c0_i32_0 = arith.constant 0 : i32
    return %arg0, %c0_i32 : i32, i32
  }
  func.func @transform_2(%arg0: i32) -> (i32, i32) {
    %c0_i32 = arith.constant 0 : i32
    %c0_i32_0 = arith.constant 0 : i32
    return %arg0, %c0_i32 : i32, i32
  }
  func.func @transform_3(%arg0: i32) -> (i32, i32) {
    %c0_i32 = arith.constant 0 : i32
    %c0_i32_0 = arith.constant 0 : i32
    %c0_i32_1 = arith.constant 0 : i32
    return %c0_i32, %c0_i32_0 : i32, i32
  }
  func.func @transform_4(%arg0: i32) -> (i32, i32) {
    %c0_i32 = arith.constant 0 : i32
    %c0_i32_0 = arith.constant 0 : i32
    return %arg0, %c0_i32 : i32, i32
  }
}

</mosaic_0001>

<bundles_post_ra>
// kernel: tpu_custom_call.1
= control target key start
LH: loop header
LB: loop body
LE: loop exit
PB: predicated region body
PF: predicated region fallthrough
CT: control target
= control target key end

     0   :  { %vm41_vm0 = vcmask 261120   ;;  %v74_v1 = vmov 0   ;;  %v21_v7 = vlaneseq  ;;  %vm60_vm2 = vcmask 7168   ;;  %s118_s0 = inlined_call_operand.vmem [shape: f32[8,32], index: 0, kind: input, shape index: {}]   ;;  %s119_s1 = inlined_call_operand.vmem [shape: s32[8,1], index: 1, kind: input, shape index: {}]   ;;  %s120_s2 = inlined_call_operand.vmem [shape: f32[8,1], index: 2, kind: input, shape index: {}]   ;;  %s121_s3 = inlined_call_operand.vmem [shape: f32[1,32], index: 3, kind: input, shape index: {}]   ;;  %s122_s4 = inlined_call_operand.vmem [shape: f32[8,1], index: 4, kind: output, shape index: {}]  }
   0x1   :  { %v17_v0 = vld [vmem:[%s118_s0] sm:$0xff]  ;;  %68 = vset.pattern.permute.xlu0 %v74_v1  ;;  %69 = vset.pattern.permute.xlu1 %v74_v1 }
   0x2   :  { %v18_v2 = vld [vmem:[%s119_s1] sm:$0xff]  ;;  %v42_v3 = vsel %vm41_vm0, %v17_v0, -inf  ;;  %v22_v10 = vand.u32 127, %v21_v7 }
   0x3   :  { %24 = vperm.xlu1 %69, %v18_v2   ;;  %43 = vmax.xlane.f32.xlu0 %v42_v3  ;;  %v19_v4 = vld [vmem:[%s120_s2] sm:$0xff] }
   0x4   :  { %v66_v9 = vld [vmem:[%s121_s3] ss:$0 sm:$0xff] }
  0x19   :  { %29 = vperm.xlu0 %68, %v19_v4  }
  0x82   :  { %v25_v11 = vpop.permute.xlu1 %24 }
  0x83   :  { %vm26_vm1 = vcmp.eq.s32.totalorder %v22_v10, %v25_v11 }
  0x84   :  { %v52_v19 = vsel %vm26_vm1, %v17_v0, 0.0 }
  0x85   :  { %v53_v20 = vsel %vm41_vm0, %v52_v19, 0.0 }
  0x90   :  { %v44_v5 = vpop.xlane.xlu0 %43 }
  0x91   :  { %v45_v6 = vsub.f32 %v17_v0, %v44_v5 }
  0x93   :  { %v46_v8 = vmul.f32 1.442695, %v45_v6 }
  0x95   :  { %70 = vpow2.f32 %v46_v8 }
  0x98   :  { %v30_v12 = vpop.permute.xlu0 %29 }
  0x99   :  { %v38_v13 = vmul.f32 %v66_v9, %v30_v12 }
  0x9b   :  { %v39_v14 = vsub.f32 1.0, %v38_v13 }
  0x9d   :  { %v40_v15 = vsel %vm26_vm1, 1.0, %v39_v14 }
  0x9f   :  { %v71_v16 = vpop.eup %70 }
  0xa0   :  { %v48_v17 = vmul.f32 %v71_v16, %v40_v15 }
  0xa2   :  { %v49_v18 = vsel %vm41_vm0, %v48_v17, 0.0 }
  0xa3   :  { %50 = vadd.xlane.f32.xlu1 %v49_v18 }
  0xa7   :  { %54 = vadd.xlane.f32.xlu1 %v53_v20 }
 0x130   :  { %v51_v21 = vpop.xlane.xlu1 %50 }
 0x131   :  { %72 = vlog2.f32 %v51_v21 }
 0x134   :  { %v55_v25 = vpop.xlane.xlu1 %54 }
 0x13b   :  { %v73_v22 = vpop.eup %72 }
 0x13c   :  { %v57_v23 = vmul.f32 0.6931472, %v73_v22 }
 0x13e   :  { %v58_v24 = vadd.f32 %v57_v23, %v44_v5 }
 0x140   :  { %v59_v26 = vsub.f32 %v58_v24, %v55_v25 }
 0x142   :  { %61 = vst.msk [vmem:[%s122_s4] sm:$0xff] %vm60_vm2, %v59_v26 }

</bundles_post_ra>
